<compile_context>
chip_gen: v7x
topology: tpu7x:2x2x1
jax: 0.10.0
libtpu: 0.0.40
codegen_flags: <defaults>
</compile_context>

<pallas_src>
import functools

import numpy as np
import jax
import jax.numpy as jnp
from jax.experimental import pallas as pl
from jax.experimental.pallas import tpu as pltpu

H, W = 28, 28                      # forced by torch.reshape(x, (1, 1, 28, 28))
KH, KW = 3, 3
OH, OW = H - KH + 1, W - KW + 1    # 26, 26 (valid conv, stride 1, no padding)
PH, PW = 32, 128                   # lane-dense padded slab (sublane x lane)

# Module default filters (exactly the nn.Parameter values from __init__).
DEFAULT_SX = (np.array([[-1.0, 0.0, 1.0],
                        [-2.0, 0.0, 2.0],
                        [-1.0, 0.0, 1.0]]) / 8.0).astype(np.float32)
DEFAULT_SY = (np.array([[-1.0, -2.0, -1.0],
                        [0.0,  0.0,  0.0],
                        [1.0,  2.0,  1.0]]) / 8.0).astype(np.float32)


def _stage_input(x_ref, slab_ref):
    """Stage the raw (28, 28) input into a lane-dense (32, 128) slab."""
    slab_ref[...] = jnp.zeros((PH, PW), jnp.float32)
    slab_ref[0:H, 0:W] = x_ref[...]
    return slab_ref[...]


def _default_sobel_kernel(x_ref, out_ref, slab_ref):
    """Separable default-weight Sobel (valid region of output = [:26, :26])."""
    x = _stage_input(x_ref, slab_ref)

    # Horizontal passes (lane-direction shifts; "shift left by d" == roll PW-d).
    x_l1 = pltpu.roll(x, PW - 1, axis=1)       # x[:, j+1]
    x_l2 = pltpu.roll(x, PW - 2, axis=1)       # x[:, j+2]
    dxh = x_l2 - x                             # horizontal derivative [-1, 0, 1]
    sh = x + 2.0 * x_l1 + x_l2                 # horizontal smooth     [ 1, 2, 1]

    # Vertical passes (sublane-direction shifts).
    gx = dxh + 2.0 * pltpu.roll(dxh, PH - 1, axis=0) + pltpu.roll(dxh, PH - 2, axis=0)
    gy = pltpu.roll(sh, PH - 2, axis=0) - sh

    # Merged, lane-dense output: [0] = gx, [1] = gy (valid in [:26, :26]).
    out_ref[0] = gx * 0.125
    out_ref[1] = gy * 0.125


def _make_generic_kernel(sx, sy):
    """Generic tap kernel for non-default filters (constants baked in)."""
    taps = [(di, dj) for di in range(KH) for dj in range(KW)
            if sx[di, dj] != 0.0 or sy[di, dj] != 0.0]
    needed_dj = sorted({dj for _, dj in taps})

    def kernel(x_ref, out_ref, slab_ref):
        x = _stage_input(x_ref, slab_ref)
        cols = {dj: (x if dj == 0 else pltpu.roll(x, PW - dj, axis=1))
                for dj in needed_dj}
        patches = {}

        def patch(di, dj):
            if (di, dj) not in patches:
                c = cols[dj]
                patches[(di, dj)] = c if di == 0 else pltpu.roll(c, PH - di, axis=0)
            return patches[(di, dj)]

        gx = jnp.zeros((PH, PW), jnp.float32)
        gy = jnp.zeros((PH, PW), jnp.float32)
        for di, dj in taps:                     # zero taps already folded out
            p = patch(di, dj)
            if sx[di, dj] != 0.0:
                gx = gx + float(sx[di, dj]) * p
            if sy[di, dj] != 0.0:
                gy = gy + float(sy[di, dj]) * p
        out_ref[0] = gx
        out_ref[1] = gy

    return kernel


@functools.lru_cache(maxsize=None)
def _get_sobel_fn(sx_bytes, sy_bytes):
    """Build (once) the pallas_call + jitted wrapper for a given weight pair."""
    sx = np.frombuffer(sx_bytes, dtype=np.float32).reshape(KH, KW).copy()
    sy = np.frombuffer(sy_bytes, dtype=np.float32).reshape(KH, KW).copy()

    if np.array_equal(sx, DEFAULT_SX) and np.array_equal(sy, DEFAULT_SY):
        kernel = _default_sobel_kernel          # separable fast path
    else:
        kernel = _make_generic_kernel(sx, sy)

    call = pl.pallas_call(
        kernel,
        out_shape=jax.ShapeDtypeStruct((2, PH, PW), jnp.float32),
        # (28, 28) == full array dims, so the (8, 128) block rule is satisfied.
        in_specs=[pl.BlockSpec((H, W), lambda: (0, 0))],
        out_specs=pl.BlockSpec((2, PH, PW), lambda: (0, 0, 0)),
        scratch_shapes=[pltpu.VMEM((PH, PW), jnp.float32)],
    )

    @jax.jit
    def run(x):
        x2d = jnp.reshape(x, (H, W)).astype(jnp.float32)
        out = call(x2d)
        gx = out[0, :OH, :OW][None, :, :]
        gy = out[1, :OH, :OW][None, :, :]
        # PyTorch: conv output (1, 1, 26, 26) -> .squeeze(0) -> (1, 26, 26)
        return gx, gy

    return run


def sobel_forward(x, sx=DEFAULT_SX, sy=DEFAULT_SY):
    """x: any f32 array with 784 elements (mirrors torch.reshape in forward).

    Returns (gx, gy), each (1, 26, 26) f32, matching PyTorch's gx.squeeze(0).
    Filters must be concrete host arrays (like nn.Parameter at init time);
    np.asarray raises if a traced value is passed.
    """
    sx = np.asarray(sx, dtype=np.float32).reshape(KH, KW)
    sy = np.asarray(sy, dtype=np.float32).reshape(KH, KW)
    return _get_sobel_fn(sx.tobytes(), sy.tobytes())(x)


if __name__ == "__main__":
    # Deterministic example input with 28*28 elements (what forward implies).
    key = jax.random.PRNGKey(0)
    x = jax.random.normal(key, (1, 1, H, W), dtype=jnp.float32)

    gx, gy = sobel_forward(x)
    jax.block_until_ready((gx, gy))

    # Sanity check against a pure-JAX valid-conv reference.
    x2d = jnp.reshape(x, (H, W)).astype(jnp.float32)
    sx = jnp.asarray(DEFAULT_SX)
    sy = jnp.asarray(DEFAULT_SY)
    ref_gx = jax.lax.conv_general_dilated(
        x2d[None, None], sx[None, None], window_strides=(1, 1),
        padding="VALID")[0]
    ref_gy = jax.lax.conv_general_dilated(
        x2d[None, None], sy[None, None], window_strides=(1, 1),
        padding="VALID")[0]

    assert gx.shape == (1, OH, OW) and gy.shape == (1, OH, OW)
    np.testing.assert_allclose(np.asarray(gx), np.asarray(ref_gx),
                               rtol=1e-5, atol=1e-5)
    np.testing.assert_allclose(np.asarray(gy), np.asarray(ref_gy),
                               rtol=1e-5, atol=1e-5)

    # Also exercise the generic (non-default weight) fallback path once.
    gx2, gy2 = sobel_forward(x, DEFAULT_SX * 2.0, DEFAULT_SY * 2.0)
    jax.block_until_ready((gx2, gy2))
    np.testing.assert_allclose(np.asarray(gx2), 2.0 * np.asarray(ref_gx),
                               rtol=1e-5, atol=1e-5)
    np.testing.assert_allclose(np.asarray(gy2), 2.0 * np.asarray(ref_gy),
                               rtol=1e-5, atol=1e-5)

    print("KERNEL_OK")
</pallas_src>

<mosaic_0001>
module attributes {stable_mosaic.version = 11 : i64} {
  func.func @_default_sobel_kernel(%arg0: memref<28x28xf32, #tpu.memory_space<vmem>>, %arg1: memref<2x32x128xf32, #tpu.memory_space<vmem>>, %arg2: memref<32x128xf32, #tpu.memory_space<vmem>>) attributes {dimension_semantics = [], scalar_prefetch = 0 : i64, scratch_operands = 1 : i64, tpu.core_type = #tpu.core_type<tc>} {
    %cst = arith.constant 0.000000e+00 : f32
    %0 = vector.broadcast %cst : f32 to vector<32x128xf32>
    %c0 = arith.constant 0 : index
    %c0_0 = arith.constant 0 : index
    %1 = vector.load %arg2[%c0, %c0_0] : memref<32x128xf32, #tpu.memory_space<vmem>>, vector<32x128xf32>
    tpu.vector_store %arg2[%c0, %c0_0], %0 {strides = array<i32>} : memref<32x128xf32, #tpu.memory_space<vmem>>, vector<32x128xf32>,
    %c0_1 = arith.constant 0 : index
    %c0_2 = arith.constant 0 : index
    %2 = vector.load %arg0[%c0_1, %c0_2] : memref<28x28xf32, #tpu.memory_space<vmem>>, vector<28x28xf32>
    %c0_3 = arith.constant 0 : index
    %c0_4 = arith.constant 0 : index
    %3 = vector.load %arg2[%c0_3, %c0_4] : memref<32x128xf32, #tpu.memory_space<vmem>>, vector<28x28xf32>
    tpu.vector_store %arg2[%c0_3, %c0_4], %2 {strides = array<i32>} : memref<32x128xf32, #tpu.memory_space<vmem>>, vector<28x28xf32>,
    %c0_5 = arith.constant 0 : index
    %c0_6 = arith.constant 0 : index
    %4 = vector.load %arg2[%c0_5, %c0_6] : memref<32x128xf32, #tpu.memory_space<vmem>>, vector<32x128xf32>
    %c127_i32 = arith.constant 127 : i32
    %5 = tpu.dynamic_rotate %4 by %c127_i32 dim 1 : vector<32x128xf32>, i32 -> vector<32x128xf32>
    %c126_i32 = arith.constant 126 : i32
    %6 = tpu.dynamic_rotate %4 by %c126_i32 dim 1 : vector<32x128xf32>, i32 -> vector<32x128xf32>
    %7 = arith.subf %6, %4 : vector<32x128xf32>
    %cst_7 = arith.constant 2.000000e+00 : f32
    %8 = vector.broadcast %cst_7 : f32 to vector<32x128xf32>
    %9 = arith.mulf %8, %5 : vector<32x128xf32>
    %10 = arith.addf %4, %9 : vector<32x128xf32>
    %11 = arith.addf %10, %6 : vector<32x128xf32>
    %c31_i32 = arith.constant 31 : i32
    %12 = tpu.dynamic_rotate %7 by %c31_i32 dim 0 : vector<32x128xf32>, i32 -> vector<32x128xf32>
    %cst_8 = arith.constant 2.000000e+00 : f32
    %13 = vector.broadcast %cst_8 : f32 to vector<32x128xf32>
    %14 = arith.mulf %13, %12 : vector<32x128xf32>
    %15 = arith.addf %7, %14 : vector<32x128xf32>
    %c30_i32 = arith.constant 30 : i32
    %16 = tpu.dynamic_rotate %7 by %c30_i32 dim 0 : vector<32x128xf32>, i32 -> vector<32x128xf32>
    %17 = arith.addf %15, %16 : vector<32x128xf32>
    %c30_i32_9 = arith.constant 30 : i32
    %18 = tpu.dynamic_rotate %11 by %c30_i32_9 dim 0 : vector<32x128xf32>, i32 -> vector<32x128xf32>
    %19 = arith.subf %18, %11 : vector<32x128xf32>
    %cst_10 = arith.constant 1.250000e-01 : f32
    %20 = vector.broadcast %cst_10 : f32 to vector<32x128xf32>
    %21 = arith.mulf %17, %20 : vector<32x128xf32>
    %c0_11 = arith.constant 0 : index
    %c0_12 = arith.constant 0 : index
    %c0_13 = arith.constant 0 : index
    %22 = vector.load %arg1[%c0_11, %c0_12, %c0_13] : memref<2x32x128xf32, #tpu.memory_space<vmem>>, vector<1x32x128xf32>
    %23 = vector.shape_cast %22 : vector<1x32x128xf32> to vector<32x128xf32>
    %24 = vector.shape_cast %21 : vector<32x128xf32> to vector<1x32x128xf32>
    tpu.vector_store %arg1[%c0_11, %c0_12, %c0_13], %24 {strides = array<i32>} : memref<2x32x128xf32, #tpu.memory_space<vmem>>, vector<1x32x128xf32>,
    %cst_14 = arith.constant 1.250000e-01 : f32
    %25 = vector.broadcast %cst_14 : f32 to vector<32x128xf32>
    %26 = arith.mulf %19, %25 : vector<32x128xf32>
    %c1 = arith.constant 1 : index
    %c0_15 = arith.constant 0 : index
    %c0_16 = arith.constant 0 : index
    %27 = vector.load %arg1[%c1, %c0_15, %c0_16] : memref<2x32x128xf32, #tpu.memory_space<vmem>>, vector<1x32x128xf32>
    %28 = vector.shape_cast %27 : vector<1x32x128xf32> to vector<32x128xf32>
    %29 = vector.shape_cast %26 : vector<32x128xf32> to vector<1x32x128xf32>
    tpu.vector_store %arg1[%c1, %c0_15, %c0_16], %29 {strides = array<i32>} : memref<2x32x128xf32, #tpu.memory_space<vmem>>, vector<1x32x128xf32>,
    return
  }
}

</mosaic_0001>

<bundles_post_ra>
// kernel: run.1
= control target key start
LH: loop header
LB: loop body
LE: loop exit
PB: predicated region body
PF: predicated region fallthrough
CT: control target
= control target key end

     0   :  { %vm16_vm0 = vcmask 228352   ;;  %vm20_vm1 = vcmask 224256   ;;  %v130_v0 = vmov 0.0   ;;  %s131_s14 = smov 127   ;;  %s132_s15 = smov 126   ;;  %v62_v11 = vlaneseq  ;;  %s207_s0 = inlined_call_operand.vmem [shape: f32[28,28], index: 0, kind: input, shape index: {}]   ;;  %s208_s1 = inlined_call_operand.vmem [shape: f32[2,32,128], index: 1, kind: output, shape index: {}]  }
   0x1   :  { %10 = vst [vmem:[#allocation2 + $0x10] sm:$0xff] %v130_v0  ;;  %v14_v1 = vld [vmem:[%s207_s0 + $0x10] sm:$0xff]  ;;  %8 = vst [vmem:[#allocation2] sm:$0xff] %v130_v0  ;;  %v12_v2 = vld [vmem:[%s207_s0] sm:$0xff] }
   0x2   :  { %9 = vst [vmem:[#allocation2 + $0x8] sm:$0xff] %v130_v0  ;;  %11 = vst [vmem:[#allocation2 + $0x18] sm:$0xff] %v130_v0  ;;  %v15_v3 = vld [vmem:[%s207_s0 + $0x18] sm:$0xf]  ;;  %v13_v4 = vld [vmem:[%s207_s0 + $0x8] sm:$0xff]  ;;  %v155_v16 = vshrl.u32 %v62_v11, 7 }
   0x3   :  { %19 = vst.msk [vmem:[#allocation2 + $0x10] sm:$0xff] %vm16_vm0, %v14_v1  ;;  %17 = vst.msk [vmem:[#allocation2] sm:$0xff] %vm16_vm0, %v12_v2 }
   0x4   :  { %21 = vst.msk [vmem:[#allocation2 + $0x18] sm:$0xf] %vm20_vm1, %v15_v3  ;;  %vm64_vm2 = vcmp.lt.s32.totalorder %v155_v16, 7  ;;  %vm81_vm3 = vcmp.lt.s32.totalorder %v155_v16, 6 }
   0x5   :  { %18 = vst.msk [vmem:[#allocation2 + $0x8] sm:$0xff] %vm16_vm0, %v13_v4 }
   0xa   :  { %v24_v5 = vld [vmem:[#allocation2 + $0x10] sm:$0xff]  ;;  %v22_v6 = vld [vmem:[#allocation2] sm:$0xff] }
   0xb   :  { %30 = vrot.lane.b32.xlu1 %v24_v5, %s131_s14  ;;  %26 = vrot.lane.b32.xlu0 %v22_v6, %s131_s14  ;;  %v25_v7 = vld [vmem:[#allocation2 + $0x18] sm:$0xff] }
   0xc   :  { %v23_v8 = vld [vmem:[#allocation2 + $0x8] sm:$0xff] }
   0xf   :  { %32 = vrot.lane.b32.xlu1 %v25_v7, %s131_s14  ;;  %28 = vrot.lane.b32.xlu0 %v23_v8, %s131_s14 }
  0x13   :  { %36 = vrot.lane.b32.xlu1 %v23_v8, %s132_s15  ;;  %34 = vrot.lane.b32.xlu0 %v22_v6, %s132_s15 }
  0x17   :  { %40 = vrot.lane.b32.xlu1 %v25_v7, %s132_s15  ;;  %38 = vrot.lane.b32.xlu0 %v24_v5, %s132_s15 }
  0x7d   :  { %v31_v9 = vpop.permute.xlu1 %30  ;;  %v27_v10 = vpop.permute.xlu0 %26 }
  0x7e   :  { %v46_v12 = vmul.f32 2.0, %v27_v10  ;;  %v48_v20 = vmul.f32 2.0, %v31_v9 }
  0x80   :  { %v50_v17 = vadd.f32 %v46_v12, %v22_v6  ;;  %v52_v35 = vadd.f32 %v48_v20, %v24_v5 }
  0x81   :  { %v33_v13 = vpop.permute.xlu1 %32  ;;  %v29_v14 = vpop.permute.xlu0 %28 }
  0x82   :  { %v47_v15 = vmul.f32 2.0, %v29_v14  ;;  %v49_v18 = vmul.f32 2.0, %v33_v13 }
  0x84   :  { %v51_v19 = vadd.f32 %v47_v15, %v23_v8  ;;  %v53_v30 = vadd.f32 %v49_v18, %v25_v7 }
  0x85   :  { %v37_v21 = vpop.permute.xlu1 %36  ;;  %v35_v22 = vpop.permute.xlu0 %34 }
  0x86   :  { %v43_v23 = vsub.f32 %v37_v21, %v23_v8  ;;  %v55_v24 = vadd.f32 %v51_v19, %v37_v21  ;;  %v42_v25 = vsub.f32 %v35_v22, %v22_v6  ;;  %v54_v26 = vadd.f32 %v50_v17, %v35_v22 }
  0x88   :  { %v59_v27 = vrot.slane %v43_v23, 1  ;;  %v91_v28 = vrot.slane %v55_v24, 2  ;;  %v58_v29 = vrot.slane %v42_v25, 1  ;;  %v78_v31 = vrot.slane %v43_v23, 2 }
  0x89   :  { %v77_v32 = vrot.slane %v42_v25, 2  ;;  %v90_v33 = vrot.slane %v54_v26, 2  ;;  %v41_v34 = vpop.permute.xlu1 %40  ;;  %v39_v36 = vpop.permute.xlu0 %38 }
  0x8a   :  { %v67_v37 = vsel %vm64_vm2, %v58_v29, %v59_v27  ;;  %v45_v38 = vsub.f32 %v41_v34, %v25_v7  ;;  %v57_v39 = vadd.f32 %v53_v30, %v41_v34  ;;  %v44_v40 = vsub.f32 %v39_v36, %v24_v5 }
  0x8b   :  { %v69_v41 = vmul.f32 2.0, %v67_v37  ;;  %v96_v42 = vsel %vm81_vm3, %v90_v33, %v91_v28  ;;  %v56_v43 = vadd.f32 %v52_v35, %v39_v36  ;;  %v84_v49 = vsel %vm81_vm3, %v77_v32, %v78_v31 }
  0x8c   :  { %v98_v44 = vsub.f32 %v96_v42, %v54_v26  ;;  %v61_v45 = vrot.slane %v45_v38, 1  ;;  %v80_v46 = vrot.slane %v45_v38, 2  ;;  %v93_v47 = vrot.slane %v57_v39, 2 }
  0x8d   :  { %v73_v48 = vadd.f32 %v69_v41, %v42_v25  ;;  %v60_v50 = vrot.slane %v44_v40, 1  ;;  %v79_v51 = vrot.slane %v44_v40, 2  ;;  %v92_v55 = vrot.slane %v56_v43, 2 }
  0x8e   :  { %v110_v52 = vmul.f32 0.125, %v98_v44  ;;  %v68_v53 = vsel %vm64_vm2, %v61_v45, %v58_v29  ;;  %v97_v54 = vsel %vm81_vm3, %v93_v47, %v90_v33  ;;  %v85_v60 = vsel %vm81_vm3, %v80_v46, %v77_v32 }
  0x8f   :  { %v86_v56 = vadd.f32 %v84_v49, %v73_v48  ;;  %v72_v57 = vmul.f32 2.0, %v68_v53  ;;  %v101_v58 = vsub.f32 %v97_v54, %v57_v39  ;;  %v65_v59 = vsel %vm64_vm2, %v60_v50, %v61_v45 }
  0x90   :  { %123 = vst [vmem:[%s208_s1 + $0x20] sm:$0xff] %v110_v52  ;;  %v66_v61 = vsel %vm64_vm2, %v59_v27, %v60_v50  ;;  %v71_v62 = vmul.f32 2.0, %v65_v59  ;;  %v82_v4 = vsel %vm81_vm3, %v79_v51, %v80_v46  ;;  %v94_v5 = vsel %vm81_vm3, %v92_v55, %v93_v47 }
  0x91   :  { %v102_v63 = vmul.f32 0.125, %v86_v56  ;;  %v76_v0 = vadd.f32 %v72_v57, %v45_v38  ;;  %v113_v1 = vmul.f32 0.125, %v101_v58  ;;  %v70_v2 = vmul.f32 2.0, %v66_v61 }
  0x92   :  { %v75_v3 = vadd.f32 %v71_v62, %v44_v40  ;;  %v95_v6 = vsel %vm81_vm3, %v91_v28, %v92_v55  ;;  %v100_v10 = vsub.f32 %v94_v5, %v56_v43  ;;  %v83_v11 = vsel %vm81_vm3, %v78_v31, %v79_v51 }
  0x93   :  { %106 = vst [vmem:[%s208_s1] sm:$0xff] %v102_v63  ;;  %v89_v7 = vadd.f32 %v85_v60, %v76_v0  ;;  %126 = vst [vmem:[%s208_s1 + $0x38] sm:$0xff] %v113_v1  ;;  %v74_v8 = vadd.f32 %v70_v2, %v43_v23  ;;  %v99_v9 = vsub.f32 %v95_v6, %v55_v24 }
  0x94   :  { %v88_v12 = vadd.f32 %v82_v4, %v75_v3  ;;  %v112_v17 = vmul.f32 0.125, %v100_v10 }
  0x95   :  { %v105_v13 = vmul.f32 0.125, %v89_v7  ;;  %v87_v14 = vadd.f32 %v83_v11, %v74_v8  ;;  %v111_v15 = vmul.f32 0.125, %v99_v9 }
  0x96   :  { %v104_v18 = vmul.f32 0.125, %v88_v12  ;;  %125 = vst [vmem:[%s208_s1 + $0x30] sm:$0xff] %v112_v17 }
  0x97   :  { %109 = vst [vmem:[%s208_s1 + $0x18] sm:$0xff] %v105_v13  ;;  %v103_v19 = vmul.f32 0.125, %v87_v14  ;;  %124 = vst [vmem:[%s208_s1 + $0x28] sm:$0xff] %v111_v15 }
  0x98   :  { %108 = vst [vmem:[%s208_s1 + $0x10] sm:$0xff] %v104_v18 }
  0x99   :  { %107 = vst [vmem:[%s208_s1 + $0x8] sm:$0xff] %v103_v19 }

</bundles_post_ra>
